<compile_context>
chip_gen: v7x
topology: tpu7x:2x2x1
jax: 0.10.0
libtpu: 0.0.40
codegen_flags: <defaults>
</compile_context>

<pallas_src>
import functools

import numpy as np
import jax
import jax.numpy as jnp
from jax import lax
from jax.experimental import pallas as pl
from jax.experimental.pallas import tpu as pltpu


_PAD_COORD = 1.0e6    # padded point coordinate -> its p underflows to exactly 0
_PAD_MIN = 1.0e30     # added to padded p before the min reduction
_CHUNK_ROWS = 8       # (8, 128) f32 chunk = one vreg per temporary


# ----------------------------------------------------------------------------
# Pallas kernel: accumulate per-point visibility log-odds over waypoints
# ----------------------------------------------------------------------------
def _traj_vis_kernel(poses_ref, quats_ref, x_ref, y_ref, z_ref, pad_ref,
                     lo_ref, p_scratch, *, n_wps, n_chunks, chunk_rows,
                     kmat, img_w, img_h, min_dist, max_dist, eps):
    # ---- compile-time scalars (hoisted constant divides) ----
    mean_d = (min_dist + max_dist) * 0.5
    std_d = (max_dist - min_dist) * 0.5
    neg_half_inv_var = (-0.5 / (std_d * std_d)) if std_d != 0.0 else float("-inf")
    cx = img_w * 0.5
    cy = img_h * 0.5
    cb = -0.5 / (img_w * img_w)     # fused: -0.5 * ((u/w - cx)/img_w)^2
    cc = -0.5 / (img_h * img_h)

    def proj(coefs, Xc, Yc, Zc):
        # One row of the (compile-time) intrinsics applied to the camera-frame
        # point; zero / unit entries are constant-folded away in Python.
        out = None
        for coef, comp in zip(coefs, (Xc, Yc, Zc)):
            if coef == 0.0:
                continue
            term = comp if coef == 1.0 else coef * comp
            out = term if out is None else out + term
        return jnp.zeros_like(Xc) if out is None else out

    lo_ref[...] = jnp.zeros_like(lo_ref)

    def waypoint_body(i, carry):
        # per-waypoint scalars (SMEM reads + scalar math: free vs. vector work)
        tx = poses_ref[i, 0]; ty = poses_ref[i, 1]; tz = poses_ref[i, 2]
        qw = quats_ref[i, 0]; qx = quats_ref[i, 1]
        qy = quats_ref[i, 2]; qz = quats_ref[i, 3]

        # F.normalize (eps=1e-12) followed by quaternion_invert (conjugate)
        qn = jnp.sqrt(qw * qw + qx * qx + qy * qy + qz * qz)
        qs = 1.0 / jnp.maximum(qn, 1e-12)
        qw_ = qw * qs
        qx_ = -qx * qs
        qy_ = -qy * qs
        qz_ = -qz * qs
        # 2x-scaled imaginary part once per waypoint (saves 3 vmuls / point)
        qx2 = qx_ + qx_; qy2 = qy_ + qy_; qz2 = qz_ + qz_

        def compute_p(xs, ys, zs):
            # ---- to_camera_frame: translate, then rotate by q_inv ----
            X = xs - tx; Y = ys - ty; Z = zs - tz
            tX = qy2 * Z - qz2 * Y            # t = 2 * (u x v)
            tY = qz2 * X - qx2 * Z
            tZ = qx2 * Y - qy2 * X
            Xc = X + qw_ * tX + (qy_ * tZ - qz_ * tY)
            Yc = Y + qw_ * tY + (qz_ * tX - qx_ * tZ)
            Zc = Z + qw_ * tZ + (qx_ * tY - qy_ * tX)

            # ---- get_dist_mask exponent (Gaussian of || p - mean ||) ----
            dx = Xc - mean_d; dy = Yc - mean_d; dz = Zc - mean_d
            a = (dx * dx + dy * dy + dz * dz) * neg_half_inv_var

            # ---- get_fov_mask (soft branch), pinhole K constant-folded ----
            u = proj(kmat[0], Xc, Yc, Zc)
            v = proj(kmat[1], Xc, Yc, Zc)
            w = proj(kmat[2], Xc, Yc, Zc)
            inv_w = pl.reciprocal(w + eps, approx=True)
            du = u * inv_w - cx
            dv = v * inv_w - cy
            # width/height gaussians and the dist gaussian fused into ONE exp
            e = a + cb * (du * du) + cc * (dv * dv)
            depth_sigmoid = 0.5 * (jnp.tanh(0.5 * w) + 1.0)
            return jnp.exp(e) * depth_sigmoid

        # ---- pass 1: p -> scratch plane, running (masked) min / max ----
        def pass1(c, mm):
            pmin, pmax = mm
            r0 = pl.multiple_of(c * chunk_rows, chunk_rows)
            rows = pl.ds(r0, chunk_rows)
            p = compute_p(x_ref[rows, :], y_ref[rows, :], z_ref[rows, :])
            p_scratch[rows, :] = p
            # padded points were placed at 1e6 -> p == 0 exactly, so the max
            # needs no masking; the min adds the host-built 0 / 1e30 plane.
            pmin = jnp.minimum(pmin, jnp.min(p + pad_ref[rows, :]))
            pmax = jnp.maximum(pmax, jnp.max(p))
            return pmin, pmax

        init = (jnp.array(jnp.inf, jnp.float32),
                jnp.array(-jnp.inf, jnp.float32))
        pmin, pmax = lax.fori_loop(0, n_chunks, pass1, init,
                                   unroll=min(n_chunks, 4))

        # torch: p = p - p.min(); p = p / p.max()  ==  (p - min)/(max - min).
        # The eps guards p_max == p_min (torch would produce NaN there).
        inv_range = 1.0 / (pmax - pmin + eps)

        # ---- pass 2: normalize, clip, logit, accumulate into lo ----
        def pass2(c, acc):
            r0 = pl.multiple_of(c * chunk_rows, chunk_rows)
            rows = pl.ds(r0, chunk_rows)
            pn = (p_scratch[rows, :] - pmin) * inv_range
            pn = jnp.clip(pn, 0.5, 1.0 - eps)
            # log(pn / (1 - pn)) without the approx reciprocal; (1 - pn) is
            # formed exactly the way the torch reference does.
            lo = jnp.log(pn) - jnp.log(1.0 - pn)
            lo_ref[rows, :] = lo_ref[rows, :] + lo
            return acc

        lax.fori_loop(0, n_chunks, pass2, 0, unroll=min(n_chunks, 4))
        return carry

    lax.fori_loop(0, n_wps, waypoint_body, 0)


def visibility_log_odds(xs, ys, zs, min_pad, poses_sel, quats_sel, kmat_np, *,
                        img_w, img_h, min_dist, max_dist, eps):
    """xs/ys/zs/min_pad: (R, 128) f32 planes (lane+sublane dense, padded);
    poses_sel: (S, 3); quats_sel: (S, 4); kmat_np: host-side (3, 3).
    Returns the accumulated per-point log-odds as an (R, 128) f32 plane."""
    R, L = xs.shape
    S = int(poses_sel.shape[0])
    chunk_rows = min(_CHUNK_ROWS, R)
    n_chunks = R // chunk_rows          # R is a multiple of 8 by construction

    kmat = tuple(tuple(float(v) for v in row) for row in np.asarray(kmat_np))
    kernel = functools.partial(
        _traj_vis_kernel, n_wps=S, n_chunks=n_chunks, chunk_rows=chunk_rows,
        kmat=kmat, img_w=float(img_w), img_h=float(img_h),
        min_dist=float(min_dist), max_dist=float(max_dist), eps=float(eps))

    # Single-buffered planes: x, y, z, min_pad inputs + lo output + p scratch.
    plane_bytes = R * L * 4
    needed = plane_bytes * 8 + (4 << 20)                     # planes + headroom
    vmem_limit = int(min(max(needed, 32 << 20), 48 << 20))   # < 64 MiB (v7x)

    vmem_spec = pl.BlockSpec(memory_space=pltpu.MemorySpace.VMEM)
    smem_spec = pl.BlockSpec(memory_space=pltpu.MemorySpace.SMEM)
    return pl.pallas_call(
        kernel,
        out_shape=jax.ShapeDtypeStruct((R, L), jnp.float32),
        in_specs=[smem_spec, smem_spec,                 # poses, quats
                  vmem_spec, vmem_spec, vmem_spec,      # X, Y, Z planes
                  vmem_spec],                           # min-pad plane
        out_specs=vmem_spec,
        scratch_shapes=[pltpu.VMEM((R, L), jnp.float32)],  # per-waypoint p plane
        compiler_params=pltpu.CompilerParams(vmem_limit_bytes=vmem_limit),
    )(poses_sel, quats_sel, xs, ys, zs, min_pad)


# ----------------------------------------------------------------------------
# Plain-JAX glue for the tiny trajectory criterion (~8 scalars)
# ----------------------------------------------------------------------------
def length_calc(traj):
    return jnp.sum(jnp.linalg.norm(traj[1:] - traj[:-1], axis=1))


def mean_angle_calc(traj, eps=1e-6):
    p1, p2, p3 = traj[:-2], traj[1:-1], traj[2:]
    AB = p1 - p2
    AC = p3 - p2
    dot = jnp.sum(AB * AC, axis=1)
    denom = jnp.linalg.norm(AB, axis=1) * jnp.linalg.norm(AC, axis=1) + eps
    phi = jnp.arccos(dot / denom)
    return jnp.mean(phi)


class ModelTrajPallas:
    """JAX/Pallas equivalent of the PyTorch ModelTraj module."""

    def __init__(self, points, wps_poses, wps_quats, intrins, img_width,
                 img_height, min_dist=1.0, max_dist=5.0,
                 smoothness_weight=14.0, traj_length_weight=0.02):
        self.points = jnp.asarray(points, jnp.float32)       # (N, 3)
        self.poses0 = jnp.asarray(wps_poses, jnp.float32)    # (N_wps, 3)
        self.quats0 = jnp.asarray(wps_quats, jnp.float32)    # (N_wps, 4) wxyz
        # "parameters" (deepcopy of initial trajectory)
        self.poses = jnp.array(self.poses0)
        self.quats = jnp.array(self.quats0)
        self.K = jnp.asarray(intrins, jnp.float32)            # (3, 3)
        self._K_np = np.asarray(intrins, np.float32)           # compile-time K
        self.img_width, self.img_height = float(img_width), float(img_height)
        self.eps = 1e-6
        self.pc_clip_limits = [min_dist, max_dist]
        self.smoothness_weight = smoothness_weight
        self.traj_length_weight = traj_length_weight
        # TODO(synk): nn.Parameter / optimizer plumbing and device handling
        # are not translated; weights are plain arrays here.

        # Pack the (fixed) point cloud into the sublane+lane dense kernel
        # layout: pad N up to a multiple of 8*128 = 1024 so every (R, 128)
        # plane fills whole [8, 128] vregs and the output store is unmasked.
        # Padded points sit at a far coordinate so their p underflows to 0.
        N = int(self.points.shape[0])
        Np = ((N + 1023) // 1024) * 1024
        R = Np // 128
        pts = np.asarray(self.points, np.float32)
        flat = np.full((3, Np), _PAD_COORD, np.float32)
        flat[:, :N] = pts.T
        self._xs = jnp.asarray(flat[0].reshape(R, 128))
        self._ys = jnp.asarray(flat[1].reshape(R, 128))
        self._zs = jnp.asarray(flat[2].reshape(R, 128))
        minpad = np.full((Np,), _PAD_MIN, np.float32)
        minpad[:N] = 0.0
        self._min_pad = jnp.asarray(minpad.reshape(R, 128))
        self._N = N

    def forward(self, vis_wps_dist=0.5):
        N_wps = self.poses.shape[0]

        # waypoint subsampling stride (host-side, like the Python int() in torch)
        diffs = np.asarray(self.poses0[1:] - self.poses0[:-1])
        mean_wps_dist = float(np.linalg.norm(diffs, axis=1).mean())
        wps_step = int(vis_wps_dist / mean_wps_dist) + 1
        sel = np.arange(0, N_wps, wps_step)

        poses_sel = self.poses[sel]
        quats_sel = self.quats[sel]

        lo_plane = visibility_log_odds(
            self._xs, self._ys, self._zs, self._min_pad,
            poses_sel, quats_sel, self._K_np,
            img_w=self.img_width, img_h=self.img_height,
            min_dist=self.pc_clip_limits[0], max_dist=self.pc_clip_limits[1],
            eps=self.eps)
        lo_sum = lo_plane.reshape(-1)[:self._N]

        rewards = 1.0 / (1.0 + jnp.exp(-lo_sum))

        loss_vis = 1.0 / (jnp.mean(rewards) + self.eps)
        loss_l2 = jnp.linalg.norm(self.poses[0] - self.poses0[0])
        loss_smooth = self.smoothness_weight / (
            mean_angle_calc(self.poses, self.eps) + self.eps)
        loss_length = self.traj_length_weight * jnp.abs(
            length_calc(self.poses) - length_calc(self.poses0))
        return loss_vis + loss_l2 + loss_length + loss_smooth


# ----------------------------------------------------------------------------
# Demo
# ----------------------------------------------------------------------------
if __name__ == "__main__":
    key = jax.random.PRNGKey(0)
    k_pts, k_pose, k_quat = jax.random.split(key, 3)

    N_points = 300
    N_wps = 8
    img_width, img_height = 64.0, 48.0

    # point cloud in front of the trajectory, roughly within clip limits
    points = jax.random.uniform(k_pts, (N_points, 3), jnp.float32,
                                minval=0.0, maxval=8.0)

    # waypoints roughly along +x, spaced ~0.3 m, with small lateral noise
    base = jnp.arange(N_wps, dtype=jnp.float32)[:, None] * jnp.array(
        [[0.3, 0.0, 0.0]], jnp.float32)
    wps_poses = base + 0.05 * jax.random.normal(k_pose, (N_wps, 3), jnp.float32)

    # near-identity quaternions (w, x, y, z)
    wps_quats = jnp.concatenate(
        [jnp.ones((N_wps, 1), jnp.float32),
         0.1 * jax.random.normal(k_quat, (N_wps, 3), jnp.float32)], axis=1)

    intrins = jnp.array([[40.0, 0.0, 32.0],
                         [0.0, 40.0, 24.0],
                         [0.0, 0.0, 1.0]], jnp.float32)

    model = ModelTrajPallas(points, wps_poses, wps_quats, intrins,
                            img_width, img_height)
    loss = model.forward(vis_wps_dist=0.5)
    loss = jax.block_until_ready(loss)
    assert jnp.isfinite(loss), f"non-finite loss: {loss}"
    print("KERNEL_OK")
</pallas_src>

<mosaic_0001>
module attributes {stable_mosaic.version = 11 : i64} {
  func.func @_traj_vis_kernel(%arg0: memref<4x3xf32, #tpu.memory_space<smem>>, %arg1: memref<4x4xf32, #tpu.memory_space<smem>>, %arg2: memref<8x128xf32, #tpu.memory_space<vmem>>, %arg3: memref<8x128xf32, #tpu.memory_space<vmem>>, %arg4: memref<8x128xf32, #tpu.memory_space<vmem>>, %arg5: memref<8x128xf32, #tpu.memory_space<vmem>>, %arg6: memref<8x128xf32, #tpu.memory_space<vmem>>, %arg7: memref<8x128xf32, #tpu.memory_space<vmem>>) attributes {dimension_semantics = [], scalar_prefetch = 0 : i64, scratch_operands = 1 : i64, tpu.core_type = #tpu.core_type<tc>} {
    %cst = arith.constant 0.000000e+00 : f32
    %0 = vector.broadcast %cst : f32 to vector<8x128xf32>
    %c0 = arith.constant 0 : index
    %c0_0 = arith.constant 0 : index
    %1 = vector.load %arg6[%c0, %c0_0] : memref<8x128xf32, #tpu.memory_space<vmem>>, vector<8x128xf32>
    tpu.vector_store %arg6[%c0, %c0_0], %0 {strides = array<i32>} : memref<8x128xf32, #tpu.memory_space<vmem>>, vector<8x128xf32>,
    %c0_i32 = arith.constant 0 : i32
    %c4_i32 = arith.constant 4 : i32
    %2 = arith.addi %c0_i32, %c4_i32 : i32
    %c1_i32 = arith.constant 1 : i32
    scf.for %arg8 = %c0_i32 to %2 step %c1_i32  : i32 {
      %3 = arith.index_cast %arg8 : i32 to index
      %c0_2 = arith.constant 0 : index
      %4 = memref.load %arg0[%3, %c0_2] : memref<4x3xf32, #tpu.memory_space<smem>>
      %5 = arith.index_cast %arg8 : i32 to index
      %c1 = arith.constant 1 : index
      %6 = memref.load %arg0[%5, %c1] : memref<4x3xf32, #tpu.memory_space<smem>>
      %7 = arith.index_cast %arg8 : i32 to index
      %c2 = arith.constant 2 : index
      %8 = memref.load %arg0[%7, %c2] : memref<4x3xf32, #tpu.memory_space<smem>>
      %9 = arith.index_cast %arg8 : i32 to index
      %c0_3 = arith.constant 0 : index
      %10 = memref.load %arg1[%9, %c0_3] : memref<4x4xf32, #tpu.memory_space<smem>>
      %11 = arith.index_cast %arg8 : i32 to index
      %c1_4 = arith.constant 1 : index
      %12 = memref.load %arg1[%11, %c1_4] : memref<4x4xf32, #tpu.memory_space<smem>>
      %13 = arith.index_cast %arg8 : i32 to index
      %c2_5 = arith.constant 2 : index
      %14 = memref.load %arg1[%13, %c2_5] : memref<4x4xf32, #tpu.memory_space<smem>>
      %15 = arith.index_cast %arg8 : i32 to index
      %c3 = arith.constant 3 : index
      %16 = memref.load %arg1[%15, %c3] : memref<4x4xf32, #tpu.memory_space<smem>>
      %17 = arith.mulf %10, %10 : f32
      %18 = arith.mulf %12, %12 : f32
      %19 = arith.addf %17, %18 : f32
      %20 = arith.mulf %14, %14 : f32
      %21 = arith.addf %19, %20 : f32
      %22 = arith.mulf %16, %16 : f32
      %23 = arith.addf %21, %22 : f32
      %24 = math.sqrt %23 : f32
      %cst_6 = arith.constant 9.99999996E-13 : f32
      %25 = arith.maximumf %24, %cst_6 : f32
      %cst_7 = arith.constant 1.000000e+00 : f32
      %26 = arith.divf %cst_7, %25 : f32
      %27 = arith.mulf %10, %26 : f32
      %cst_8 = arith.constant 0.000000e+00 : f32
      %28 = arith.subf %cst_8, %12 : f32
      %29 = arith.mulf %28, %26 : f32
      %cst_9 = arith.constant 0.000000e+00 : f32
      %30 = arith.subf %cst_9, %14 : f32
      %31 = arith.mulf %30, %26 : f32
      %cst_10 = arith.constant 0.000000e+00 : f32
      %32 = arith.subf %cst_10, %16 : f32
      %33 = arith.mulf %32, %26 : f32
      %34 = arith.addf %29, %29 : f32
      %35 = arith.addf %31, %31 : f32
      %36 = arith.addf %33, %33 : f32
      %cst_11 = arith.constant 0x7F800000 : f32
      %cst_12 = arith.constant 0xFF800000 : f32
      %c0_i32_13 = arith.constant 0 : i32
      %c8_i32 = arith.constant 8 : i32
      %37 = arith.muli %c0_i32_13, %c8_i32 : i32
      %38 = tpu.assume_multiple %37, 8 : i32
      %39 = arith.index_cast %38 : i32 to index
      %c0_14 = arith.constant 0 : index
      %40 = vector.load %arg2[%39, %c0_14] : memref<8x128xf32, #tpu.memory_space<vmem>>, vector<8x128xf32>
      %41 = arith.index_cast %38 : i32 to index
      %c0_15 = arith.constant 0 : index
      %42 = vector.load %arg3[%41, %c0_15] : memref<8x128xf32, #tpu.memory_space<vmem>>, vector<8x128xf32>
      %43 = arith.index_cast %38 : i32 to index
      %c0_16 = arith.constant 0 : index
      %44 = vector.load %arg4[%43, %c0_16] : memref<8x128xf32, #tpu.memory_space<vmem>>, vector<8x128xf32>
      %45 = vector.broadcast %4 : f32 to vector<8x128xf32>
      %46 = arith.subf %40, %45 : vector<8x128xf32>
      %47 = vector.broadcast %6 : f32 to vector<8x128xf32>
      %48 = arith.subf %42, %47 : vector<8x128xf32>
      %49 = vector.broadcast %8 : f32 to vector<8x128xf32>
      %50 = arith.subf %44, %49 : vector<8x128xf32>
      %51 = vector.broadcast %35 : f32 to vector<8x128xf32>
      %52 = arith.mulf %51, %50 : vector<8x128xf32>
      %53 = vector.broadcast %36 : f32 to vector<8x128xf32>
      %54 = arith.mulf %53, %48 : vector<8x128xf32>
      %55 = arith.subf %52, %54 : vector<8x128xf32>
      %56 = vector.broadcast %36 : f32 to vector<8x128xf32>
      %57 = arith.mulf %56, %46 : vector<8x128xf32>
      %58 = vector.broadcast %34 : f32 to vector<8x128xf32>
      %59 = arith.mulf %58, %50 : vector<8x128xf32>
      %60 = arith.subf %57, %59 : vector<8x128xf32>
      %61 = vector.broadcast %34 : f32 to vector<8x128xf32>
      %62 = arith.mulf %61, %48 : vector<8x128xf32>
      %63 = vector.broadcast %35 : f32 to vector<8x128xf32>
      %64 = arith.mulf %63, %46 : vector<8x128xf32>
      %65 = arith.subf %62, %64 : vector<8x128xf32>
      %66 = vector.broadcast %27 : f32 to vector<8x128xf32>
      %67 = arith.mulf %66, %55 : vector<8x128xf32>
      %68 = arith.addf %46, %67 : vector<8x128xf32>
      %69 = vector.broadcast %31 : f32 to vector<8x128xf32>
      %70 = arith.mulf %69, %65 : vector<8x128xf32>
      %71 = vector.broadcast %33 : f32 to vector<8x128xf32>
      %72 = arith.mulf %71, %60 : vector<8x128xf32>
      %73 = arith.subf %70, %72 : vector<8x128xf32>
      %74 = arith.addf %68, %73 : vector<8x128xf32>
      %75 = vector.broadcast %27 : f32 to vector<8x128xf32>
      %76 = arith.mulf %75, %60 : vector<8x128xf32>
      %77 = arith.addf %48, %76 : vector<8x128xf32>
      %78 = vector.broadcast %33 : f32 to vector<8x128xf32>
      %79 = arith.mulf %78, %55 : vector<8x128xf32>
      %80 = vector.broadcast %29 : f32 to vector<8x128xf32>
      %81 = arith.mulf %80, %65 : vector<8x128xf32>
      %82 = arith.subf %79, %81 : vector<8x128xf32>
      %83 = arith.addf %77, %82 : vector<8x128xf32>
      %84 = vector.broadcast %27 : f32 to vector<8x128xf32>
      %85 = arith.mulf %84, %65 : vector<8x128xf32>
      %86 = arith.addf %50, %85 : vector<8x128xf32>
      %87 = vector.broadcast %29 : f32 to vector<8x128xf32>
      %88 = arith.mulf %87, %60 : vector<8x128xf32>
      %89 = vector.broadcast %31 : f32 to vector<8x128xf32>
      %90 = arith.mulf %89, %55 : vector<8x128xf32>
      %91 = arith.subf %88, %90 : vector<8x128xf32>
      %92 = arith.addf %86, %91 : vector<8x128xf32>
      %cst_17 = arith.constant 3.000000e+00 : f32
      %93 = vector.broadcast %cst_17 : f32 to vector<8x128xf32>
      %94 = arith.subf %74, %93 : vector<8x128xf32>
      %cst_18 = arith.constant 3.000000e+00 : f32
      %95 = vector.broadcast %cst_18 : f32 to vector<8x128xf32>
      %96 = arith.subf %83, %95 : vector<8x128xf32>
      %cst_19 = arith.constant 3.000000e+00 : f32
      %97 = vector.broadcast %cst_19 : f32 to vector<8x128xf32>
      %98 = arith.subf %92, %97 : vector<8x128xf32>
      %99 = arith.mulf %94, %94 : vector<8x128xf32>
      %100 = arith.mulf %96, %96 : vector<8x128xf32>
      %101 = arith.addf %99, %100 : vector<8x128xf32>
      %102 = arith.mulf %98, %98 : vector<8x128xf32>
      %103 = arith.addf %101, %102 : vector<8x128xf32>
      %cst_20 = arith.constant -1.250000e-01 : f32
      %104 = vector.broadcast %cst_20 : f32 to vector<8x128xf32>
      %105 = arith.mulf %103, %104 : vector<8x128xf32>
      %cst_21 = arith.constant 4.000000e+01 : f32
      %106 = vector.broadcast %cst_21 : f32 to vector<8x128xf32>
      %107 = arith.mulf %106, %74 : vector<8x128xf32>
      %cst_22 = arith.constant 3.200000e+01 : f32
      %108 = vector.broadcast %cst_22 : f32 to vector<8x128xf32>
      %109 = arith.mulf %108, %92 : vector<8x128xf32>
      %110 = arith.addf %107, %109 : vector<8x128xf32>
      %cst_23 = arith.constant 4.000000e+01 : f32
      %111 = vector.broadcast %cst_23 : f32 to vector<8x128xf32>
      %112 = arith.mulf %111, %83 : vector<8x128xf32>
      %cst_24 = arith.constant 2.400000e+01 : f32
      %113 = vector.broadcast %cst_24 : f32 to vector<8x128xf32>
      %114 = arith.mulf %113, %92 : vector<8x128xf32>
      %115 = arith.addf %112, %114 : vector<8x128xf32>
      %cst_25 = arith.constant 9.99999997E-7 : f32
      %116 = vector.broadcast %cst_25 : f32 to vector<8x128xf32>
      %117 = arith.addf %92, %116 : vector<8x128xf32>
      %118 = tpu.reciprocal %117 {approx = true} : vector<8x128xf32> -> vector<8x128xf32>
      %119 = arith.mulf %110, %118 : vector<8x128xf32>
      %cst_26 = arith.constant 3.200000e+01 : f32
      %120 = vector.broadcast %cst_26 : f32 to vector<8x128xf32>
      %121 = arith.subf %119, %120 : vector<8x128xf32>
      %122 = arith.mulf %115, %118 : vector<8x128xf32>
      %cst_27 = arith.constant 2.400000e+01 : f32
      %123 = vector.broadcast %cst_27 : f32 to vector<8x128xf32>
      %124 = arith.subf %122, %123 : vector<8x128xf32>
      %125 = arith.mulf %121, %121 : vector<8x128xf32>
      %cst_28 = arith.constant -1.22070313E-4 : f32
      %126 = vector.broadcast %cst_28 : f32 to vector<8x128xf32>
      %127 = arith.mulf %126, %125 : vector<8x128xf32>
      %128 = arith.addf %105, %127 : vector<8x128xf32>
      %129 = arith.mulf %124, %124 : vector<8x128xf32>
      %cst_29 = arith.constant -2.17013891E-4 : f32
      %130 = vector.broadcast %cst_29 : f32 to vector<8x128xf32>
      %131 = arith.mulf %130, %129 : vector<8x128xf32>
      %132 = arith.addf %128, %131 : vector<8x128xf32>
      %cst_30 = arith.constant 5.000000e-01 : f32
      %133 = vector.broadcast %cst_30 : f32 to vector<8x128xf32>
      %134 = arith.mulf %133, %92 : vector<8x128xf32>
      %135 = math.tanh %134 : vector<8x128xf32>
      %cst_31 = arith.constant 1.000000e+00 : f32
      %136 = vector.broadcast %cst_31 : f32 to vector<8x128xf32>
      %137 = arith.addf %135, %136 : vector<8x128xf32>
      %cst_32 = arith.constant 5.000000e-01 : f32
      %138 = vector.broadcast %cst_32 : f32 to vector<8x128xf32>
      %139 = arith.mulf %138, %137 : vector<8x128xf32>
      %140 = math.exp %132 : vector<8x128xf32>
      %141 = arith.mulf %140, %139 : vector<8x128xf32>
      %142 = arith.index_cast %38 : i32 to index
      %c0_33 = arith.constant 0 : index
      %143 = vector.load %arg7[%142, %c0_33] : memref<8x128xf32, #tpu.memory_space<vmem>>, vector<8x128xf32>
      tpu.vector_store %arg7[%142, %c0_33], %141 {strides = array<i32>} : memref<8x128xf32, #tpu.memory_space<vmem>>, vector<8x128xf32>,
      %144 = arith.index_cast %38 : i32 to index
      %c0_34 = arith.constant 0 : index
      %145 = vector.load %arg5[%144, %c0_34] : memref<8x128xf32, #tpu.memory_space<vmem>>, vector<8x128xf32>
      %146 = arith.addf %141, %145 : vector<8x128xf32>
      %147 = vector.shape_cast %146 : vector<8x128xf32> to vector<1x8x128xf32>
      %cst_35 = arith.constant dense<0x7F800000> : vector<1xf32>
      %148 = vector.multi_reduction <minimumf>, %147, %cst_35 [1, 2] : vector<1x8x128xf32> to vector<1xf32>
      %149 = vector.shape_cast %148 : vector<1xf32> to vector<1x1x1xf32>
      %150 = vector.extract %149[0, 0, 0] : f32 from vector<1x1x1xf32>
      %151 = arith.minimumf %cst_11, %150 : f32
      %152 = vector.shape_cast %141 : vector<8x128xf32> to vector<1x8x128xf32>
      %cst_36 = arith.constant dense<0xFF800000> : vector<1xf32>
      %153 = vector.multi_reduction <maximumf>, %152, %cst_36 [1, 2] : vector<1x8x128xf32> to vector<1xf32>
      %154 = vector.shape_cast %153 : vector<1xf32> to vector<1x1x1xf32>
      %155 = vector.extract %154[0, 0, 0] : f32 from vector<1x1x1xf32>
      %156 = arith.maximumf %cst_12, %155 : f32
      %c1_i32_37 = arith.constant 1 : i32
      %157 = arith.subf %156, %151 : f32
      %cst_38 = arith.constant 9.99999997E-7 : f32
      %158 = arith.addf %157, %cst_38 : f32
      %cst_39 = arith.constant 1.000000e+00 : f32
      %159 = arith.divf %cst_39, %158 : f32
      %c0_i32_40 = arith.constant 0 : i32
      %c8_i32_41 = arith.constant 8 : i32
      %160 = arith.muli %c0_i32_40, %c8_i32_41 : i32
      %161 = tpu.assume_multiple %160, 8 : i32
      %162 = arith.index_cast %161 : i32 to index
      %c0_42 = arith.constant 0 : index
      %163 = vector.load %arg7[%162, %c0_42] : memref<8x128xf32, #tpu.memory_space<vmem>>, vector<8x128xf32>
      %164 = vector.broadcast %151 : f32 to vector<8x128xf32>
      %165 = arith.subf %163, %164 : vector<8x128xf32>
      %166 = vector.broadcast %159 : f32 to vector<8x128xf32>
      %167 = arith.mulf %165, %166 : vector<8x128xf32>
      %cst_43 = arith.constant 5.000000e-01 : f32
      %cst_44 = arith.constant 0.999998986 : f32
      %168 = vector.broadcast %cst_43 : f32 to vector<8x128xf32>
      %169 = arith.maximumf %168, %167 : vector<8x128xf32>
      %170 = vector.broadcast %cst_44 : f32 to vector<8x128xf32>
      %171 = arith.minimumf %170, %169 : vector<8x128xf32>
      %172 = math.log %171 : vector<8x128xf32>
      %cst_45 = arith.constant 1.000000e+00 : f32
      %173 = vector.broadcast %cst_45 : f32 to vector<8x128xf32>
      %174 = arith.subf %173, %171 : vector<8x128xf32>
      %175 = math.log %174 : vector<8x128xf32>
      %176 = arith.subf %172, %175 : vector<8x128xf32>
      %177 = arith.index_cast %161 : i32 to index
      %c0_46 = arith.constant 0 : index
      %178 = vector.load %arg6[%177, %c0_46] : memref<8x128xf32, #tpu.memory_space<vmem>>, vector<8x128xf32>
      %179 = arith.addf %178, %176 : vector<8x128xf32>
      %180 = arith.index_cast %161 : i32 to index
      %c0_47 = arith.constant 0 : index
      %181 = vector.load %arg6[%180, %c0_47] : memref<8x128xf32, #tpu.memory_space<vmem>>, vector<8x128xf32>
      tpu.vector_store %arg6[%180, %c0_47], %179 {strides = array<i32>} : memref<8x128xf32, #tpu.memory_space<vmem>>, vector<8x128xf32>,
      %c1_i32_48 = arith.constant 1 : i32
    }
    %c4_i32_1 = arith.constant 4 : i32
    return
  }
}

</mosaic_0001>

<bundles_post_ra>
// kernel: tpu_custom_call.1
= control target key start
LH: loop header
LB: loop body
LE: loop exit
PB: predicated region body
PF: predicated region fallthrough
CT: control target
= control target key end

     0   :  { %11 = vsyncpa [#allocation6], 0  ;;  %s572_s0 = inlined_call_operand.hbm [shape: f32[4,3], index: 0, kind: input, shape index: {}]   ;;  %s573_s1 = inlined_call_operand.hbm [shape: f32[4,4], index: 1, kind: input, shape index: {}]   ;;  %s574_s2 = inlined_call_operand.hbm [shape: f32[8,128], index: 2, kind: input, shape index: {}]   ;;  %s575_s3 = inlined_call_operand.vmem [shape: f32[8,128], index: 3, kind: input, shape index: {}]   ;;  %s576_s4 = inlined_call_operand.hbm [shape: f32[8,128], index: 4, kind: input, shape index: {}]   ;;  %s577_s5 = inlined_call_operand.vmem [shape: f32[8,128], index: 5, kind: input, shape index: {}]   ;;  %s578_s6 = inlined_call_operand.hbm [shape: f32[8,128], index: 6, kind: output, shape index: {}]  }
   0x1   :  { %12 = vsyncpa [#allocation8], 0 }
   0x2   :  { %13 = vsyncpa [#allocation4], 0 }
   0x3   :  { %14 = vsyncpa [#allocation11], 0 }
   0x4   :  { %15 = vsyncpa [#allocation5], 0  ;;  %s306_s23 = scalar_lea.hbm %s572_s0, 64 }
   0x5   :  { %p307_p0 = scmp.ne.s32.totalorder %s572_s0, %s306_s23  ;;  %p310_p1 = scmp.lt.u32.totalorder %s306_s23, %s572_s0 }
   0x7   :  { %p312_p2 = pnand %p310_p1, %p307_p0 }
   0x9   :  { %315 = shalt.err (!%p312_p2)
}
   0xa   :  { %s410_s28 = smov [#allocation3]   ;;  %s316_s9 = scalar_lea.hbm %s573_s1, 64 }
   0xb   :  { %23 = dma.hbm_to_smem %s572_s0, 64, %s410_s28, [#allocation6]  }
   0xc   :  { %p317_p3 = scmp.ne.s32.totalorder %s573_s1, %s316_s9  ;;  %p320_p4 = scmp.lt.u32.totalorder %s316_s9, %s573_s1 }
   0xe   :  { %p322_p5 = pnand %p320_p4, %p317_p3 }
  0x10   :  { %325 = shalt.err (!%p322_p5)
}
  0x11   :  { %s411_s14 = smov [#allocation7]   ;;  %s412_s0 = smov [#allocation9]  }
  0x12   :  { %31 = dma.hbm_to_smem %s573_s1, 64, %s411_s14, [#allocation8]  }
  0x13   :  { %s38_s17 = sshll.u32 %s412_s0, 4  ;;  %s413_s18 = smov [#allocation10]   ;;  %s39_s17 = int_to_ptr.vmem [resolvable:$true] %s38_s17 }
  0x14   :  { %s50_s19 = sshll.u32 %s413_s18, 4  ;;  %s326_s22 = scalar_lea.hbm %s574_s2, 128  ;;  %s51_s19 = int_to_ptr.vmem [resolvable:$true] %s50_s19 }
  0x15   :  { %p327_p6 = scmp.ne.s32.totalorder %s574_s2, %s326_s22  ;;  %p330_p7 = scmp.lt.u32.totalorder %s326_s22, %s574_s2 }
  0x17   :  { %p332_p8 = pnand %p330_p7, %p327_p6 }
  0x19   :  { %335 = shalt.err (!%p332_p8)
}
  0x1a   :  { %s336_s1 = scalar_lea.vmem %s39_s17, 128  ;;  %p341_p10 = scmp.lt.s32.totalorder %s39_s17, %s39_s17 }
  0x1b   :  { %p337_p9 = scmp.ne.s32.totalorder %s39_s17, %s336_s1  ;;  %p342_p11 = scmp.lt.s32.totalorder %s336_s1, %s336_s1 }
  0x1d   :  { %p343_p12 = por %p342_p11, %p341_p10 }
  0x1f   :  { %p344_p13 = pnand %p343_p12, %p337_p9 }
  0x21   :  { %347 = shalt.err (!%p344_p13)
}
  0x22   :  { %41 = dma.hbm_to_vmem [thread:$0]  %s574_s2, 128, %s39_s17, [#allocation4]  }
  0x23   :  { %s348_s7 = scalar_lea.hbm %s576_s4, 128 }
  0x24   :  { %p349_p0 = scmp.ne.s32.totalorder %s576_s4, %s348_s7  ;;  %p352_p1 = scmp.lt.u32.totalorder %s348_s7, %s576_s4 }
  0x26   :  { %p354_p2 = pnand %p352_p1, %p349_p0 }
  0x28   :  { %357 = shalt.err (!%p354_p2)
}
  0x29   :  { %s358_s12 = scalar_lea.vmem %s51_s19, 128  ;;  %p363_p4 = scmp.lt.s32.totalorder %s51_s19, %s51_s19 }
  0x2a   :  { %p359_p3 = scmp.ne.s32.totalorder %s51_s19, %s358_s12  ;;  %p364_p5 = scmp.lt.s32.totalorder %s358_s12, %s358_s12 }
  0x2c   :  { %p365_p6 = por %p364_p5, %p363_p4 }
  0x2e   :  { %p366_p7 = pnand %p365_p6, %p359_p3 }
  0x30   :  { %369 = shalt.err (!%p366_p7)
}
  0x31   :  { %53 = dma.hbm_to_vmem [thread:$0]  %s576_s4, 128, %s51_s19, [#allocation11]  }
  0x32   :  { %396 = dma.done.wait [#allocation6], 64  }
  0x33   :  { %397 = vsyncadd [#allocation6], 4294967232 }
  0x34   :  { %398 = dma.done.wait [#allocation8], 64  }
  0x35   :  { %399 = vsyncadd [#allocation8], 4294967232 }
  0x36   :  { %400 = dma.done.wait [#allocation4], 128  }
  0x37   :  { %401 = vsyncadd [#allocation4], 4294967168 }
  0x38   :  { %402 = dma.done.wait [#allocation11], 128  }
  0x39   :  { %403 = vsyncadd [#allocation11], 4294967168 }
  0x3a   :  { %68 = sfence }
  0x3b   :  { %v414_v0 = vmov 0.0   ;;  %s500_s14 = smov 0  }
  0x3c   :  { %69 = vst [vmem:[#allocation12] sm:$0xff] %v414_v0 }
  0x3d LB: > { %s506_s4 = sshll.u32 %s408_s14, 7  ;;  %s415_s28 = smov 1e-12   ;;  %v118_v9 = vld [vmem:[%s575_s3] sm:$0xff]  ;;  %v119_v10 = vld [vmem:[#allocation10] sm:$0xff]  ;;  %v117_v13 = vld [vmem:[#allocation9] sm:$0xff]  ;;  %s408_s14 = sphi %s500_s14, %s75_s14  }
  0x3e   : > { %s78_s15 = sadd.s32 1, %s506_s4  ;;  %s80_s16 = sadd.s32 2, %s506_s4 }
  0x3f   : > { %s511_s0 = sld [smem:[#allocation7 + %s506_s4]]  ;;  %s85_s19 = sadd.s32 3, %s506_s4 }
  0x40   : > { %s515_s17 = sld [smem:[#allocation7 + %s78_s15]]  ;;  %s75_s14 = sadd.s32 1, %s408_s14  }
  0x41   : > { %s519_s18 = sld [smem:[#allocation7 + %s80_s16]]  ;;  %p72_p8 = scmp.ge.s32.totalorder %s75_s14, 4  }
  0x42   : > { %s522_s20 = sld [smem:[#allocation7 + %s85_s19]] }
  0x43   : > { %s79_s30 = sld [smem:[#allocation3 + %s78_s15]] }
  0x44   : > { %s81_s7 = sld [smem:[#allocation3 + %s80_s16]] }
  0x45   : > { %s87_s21 = smul.f32 %s511_s0, %s511_s0  ;;  %s77_s8 = sld [smem:[#allocation3 + %s506_s4]] }
  0x46   : > { %s88_s22 = smul.f32 %s515_s17, %s515_s17  ;;  %s108_s9 = ssub.f32 0.0, %s515_s17 }
  0x47   : > { %s90_s23 = smul.f32 %s519_s18, %s519_s18  ;;  %s110_s10 = ssub.f32 0.0, %s519_s18 }
  0x48   : > { %s89_s24 = sadd.f32 %s88_s22, %s87_s21  ;;  %s92_s25 = smul.f32 %s522_s20, %s522_s20 }
  0x49   : > { %s112_s12 = ssub.f32 0.0, %s522_s20  ;;  %v122_v11 = vstv %s79_s30 }
  0x4a   : > { %s91_s26 = sadd.f32 %s90_s23, %s89_s24  ;;  %v124_v12 = vstv %s81_s7  ;;  %v123_v15 = vsub.f32 %v118_v9, %v122_v11 }
  0x4b   : > { %v120_v14 = vstv %s77_s8  ;;  %v125_v16 = vsub.f32 %v119_v10, %v124_v12 }
  0x4c   : > { %s93_s1 = sadd.f32 %s92_s25, %s91_s26  ;;  %v121_v17 = vsub.f32 %v117_v13, %v120_v14 }
  0x4e   : > { %v94_v1 = vstv %s93_s1  ;;  %s416_s1 = smov (%p72_p8), [#allocation12]  }
  0x4f   : > { %290 = vrsqrt.f32 %v94_v1  ;;  %vm97_vm0 = vcmp.eq.f32.partialorder %v94_v1, inf  ;;  %v100_v3 = vand.u32 2147483648, %v94_v1  ;;  %vm99_vm1 = vcmp.eq.f32.partialorder %v94_v1, 0.0 }
  0x59   : > { %v291_v2 = vpop.eup %290 }
  0x5a   : > { %v96_v4 = vmul.f32 %v291_v2, %v94_v1 }
  0x5c   : > { %v98_v5 = vsel %vm97_vm0, %v94_v1, %v96_v4 }
  0x5d   : > { %v101_v6 = vsel %vm99_vm1, %v100_v3, %v98_v5 }
  0x5e   : > { %265 = vpush %v101_v6 }
  0x8f   : > { %s266_s27 = spop %265 }
  0x90   : > { %s103_s29 = smax.f32 %s415_s28, %s266_s27  ;;  %s242_s27 = sshll.u32 (%p72_p8), %s416_s1, 4  ;;  %s243_s27 = int_to_ptr.vmem [resolvable:$true] %s242_s27 }
  0x91   : > { %v104_v7 = vstv %s103_s29  ;;  %s370_s28 = scalar_lea.vmem (%p72_p8), %s243_s27, 128  ;;  %p375_p10 = scmp.lt.s32.totalorder (%p72_p8), %s243_s27, %s243_s27 }
  0x92   : > { %292 = vrcp.f32 %v104_v7  ;;  %p371_p9 = scmp.ne.s32.totalorder (%p72_p8), %s243_s27, %s370_s28  ;;  %p376_p11 = scmp.lt.s32.totalorder (%p72_p8), %s370_s28, %s370_s28 }
  0x94   :  { %p377_p12 = por (%p72_p8), %p376_p11, %p375_p10 }
  0x96   :  { %p378_p13 = pnand (%p72_p8), %p377_p12, %p371_p9 }
  0x9c   : > { %v293_v8 = vpop.eup %292 }
  0x9d   : > { %267 = vpush %v293_v8 }
  0xce   : > { %s268_s11 = spop %267 }
  0xcf   : > { %s543_s19 = smul.f32 %s268_s11, %s108_s9 }
  0xd0   : > { %s545_s15 = smul.f32 %s268_s11, %s110_s10 }
  0xd1   : > { %s113_s4 = smul.f32 %s268_s11, %s112_s12  ;;  %s114_s16 = sadd.f32 %s543_s19, %s543_s19  ;;  %v150_v32 = vstv %s543_s19 }
  0xd2   : > { %s115_s17 = sadd.f32 %s545_s15, %s545_s15  ;;  %s107_s18 = smul.f32 %s268_s11, %s511_s0  ;;  %v141_v31 = vstv %s545_s15 }
  0xd3   : > { %s116_s20 = sadd.f32 %s113_s4, %s113_s4  ;;  %v132_v18 = vstv %s114_s16  ;;  %v143_v34 = vstv %s113_s4 }
  0xd4   : > { %v126_v19 = vstv %s115_s17  ;;  %v133_v20 = vmul.f32 %v132_v18, %v125_v16  ;;  %v135_v21 = vmul.f32 %v132_v18, %v123_v15  ;;  %v138_v28 = vstv %s107_s18 }
  0xd5   : > { %v127_v22 = vmul.f32 %v126_v19, %v125_v16  ;;  %v128_v23 = vstv %s116_s20  ;;  %v136_v24 = vmul.f32 %v126_v19, %v121_v17 }
  0xd6   : > { %v129_v25 = vmul.f32 %v128_v23, %v123_v15  ;;  %v131_v26 = vmul.f32 %v128_v23, %v121_v17 }
  0xd7   : > { %v137_v27 = vsub.f32 %v135_v21, %v136_v24  ;;  %v195_v21 = vld [vmem:[%s577_s5] sm:$0xff] }
  0xd8   : > { %v130_v29 = vsub.f32 %v127_v22, %v129_v25  ;;  %v134_v30 = vsub.f32 %v131_v26, %v133_v20 }
  0xd9   : > { %v142_v33 = vmul.f32 %v141_v31, %v137_v27  ;;  %v151_v35 = vmul.f32 %v150_v32, %v137_v27  ;;  %v154_v36 = vmul.f32 %v138_v28, %v137_v27 }
  0xda   : > { %v139_v37 = vmul.f32 %v138_v28, %v130_v29  ;;  %v144_v38 = vmul.f32 %v143_v34, %v134_v30  ;;  %v147_v39 = vmul.f32 %v138_v28, %v134_v30  ;;  %v149_v40 = vmul.f32 %v143_v34, %v130_v29 }
  0xdb   : > { %v155_v41 = vadd.f32 %v154_v36, %v125_v16  ;;  %v156_v42 = vmul.f32 %v150_v32, %v134_v30  ;;  %v157_v43 = vmul.f32 %v141_v31, %v130_v29 }
  0xdc   : > { %v140_v44 = vadd.f32 %v139_v37, %v121_v17  ;;  %v145_v45 = vsub.f32 %v142_v33, %v144_v38  ;;  %v148_v46 = vadd.f32 %v147_v39, %v123_v15  ;;  %v152_v47 = vsub.f32 %v149_v40, %v151_v35 }
  0xdd   : > { %v158_v48 = vsub.f32 %v156_v42, %v157_v43 }
  0xde   : > { %v146_v49 = vadd.f32 %v145_v45, %v140_v44  ;;  %v153_v50 = vadd.f32 %v152_v47, %v148_v46 }
  0xdf   : > { %v159_v51 = vadd.f32 %v158_v48, %v155_v41 }
  0xe0   : > { %v260_v52 = vadd.f32 -3.0, %v146_v49  ;;  %v261_v53 = vadd.f32 -3.0, %v153_v50  ;;  %v169_v54 = vmul.f32 40.0, %v146_v49  ;;  %v172_v55 = vmul.f32 40.0, %v153_v50 }
  0xe1   : > { %v262_v56 = vadd.f32 -3.0, %v159_v51  ;;  %v170_v57 = vmul.f32 32.0, %v159_v51  ;;  %v173_v58 = vmul.f32 24.0, %v159_v51  ;;  %v175_v59 = vadd.f32 1e-06, %v159_v51 }
  0xe2   : > { %v163_v60 = vmul.f32 %v260_v52, %v260_v52  ;;  %v164_v61 = vmul.f32 %v261_v53, %v261_v53  ;;  %v187_v8 = vmul.f32 0.5, %v159_v51  ;;  %v233_v51 = vld [vmem:[#allocation12] sm:$0xff] }
  0xe3   : > { %v171_v62 = vadd.f32 %v170_v57, %v169_v54  ;;  %v174_v63 = vadd.f32 %v173_v58, %v172_v55  ;;  %294 = vrcp.f32 %v175_v59  ;;  %v166_v1 = vmul.f32 %v262_v56, %v262_v56 }
  0xe4   : > { %v165_v0 = vadd.f32 %v164_v61, %v163_v60  ;;  %296 = vtanh.f32 %v187_v8 }
  0xe6   : > { %v167_v2 = vadd.f32 %v166_v1, %v165_v0 }
  0xe8   : > { %v168_v11 = vmul.f32 -0.125, %v167_v2 }
  0xed   : > { %v295_v3 = vpop.eup %294 }
  0xee   : > { %v177_v4 = vmul.f32 %v295_v3, %v171_v62  ;;  %v179_v5 = vmul.f32 %v295_v3, %v174_v63  ;;  %v297_v17 = vpop.eup %296 }
  0xef   : > { %v189_v18 = vadd.f32 1.0, %v297_v17 }
  0xf0   : > { %v263_v6 = vadd.f32 -32.0, %v177_v4  ;;  %v264_v7 = vadd.f32 -24.0, %v179_v5 }
  0xf1   : > { %v190_v19 = vmul.f32 0.5, %v189_v18 }
  0xf2   : > { %v181_v9 = vmul.f32 %v263_v6, %v263_v6  ;;  %v184_v10 = vmul.f32 %v264_v7, %v264_v7 }
  0xf4   : > { %v182_v12 = vmul.f32 -0.00012207031, %v181_v9  ;;  %v185_v14 = vmul.f32 -0.00021701389, %v184_v10 }
  0xf6   : > { %v183_v13 = vadd.f32 %v182_v12, %v168_v11 }
  0xf8   : > { %v186_v15 = vadd.f32 %v185_v14, %v183_v13 }
  0xfa   : > { %v191_v16 = vmul.f32 1.442695, %v186_v15 }
  0xfc   : > { %298 = vpow2.f32 %v191_v16 }
 0x106   : > { %v299_v20 = vpop.eup %298 }
 0x107   : > { %v193_v22 = vmul.f32 %v299_v20, %v190_v19 }
 0x109   : > { %v196_v23 = vadd.f32 %v195_v21, %v193_v22 }
 0x10b   : > { %197 = vmin.xlane.f32.xlu0 %v196_v23 }
 0x10f   : > { %206 = vmax.xlane.f32.xlu0 %v193_v22 }
 0x198   : > { %v198_v24 = vpop.xlane.xlu0 %197 }
 0x199   : > { %v199_v25 = vrot.slane %v198_v24, 4 }
 0x19b   : > { %v200_v26 = vmin.f32 %v198_v24, %v199_v25 }
 0x19c   : > { %v207_v27 = vpop.xlane.xlu0 %206 }
 0x19d   : > { %v201_v28 = vrot.slane %v200_v26, 2  ;;  %v208_v29 = vrot.slane %v207_v27, 4 }
 0x19f   : > { %v209_v30 = vmax.f32 %v207_v27, %v208_v29  ;;  %v202_v31 = vmin.f32 %v200_v26, %v201_v28 }
 0x1a1   : > { %v210_v32 = vrot.slane %v209_v30, 2  ;;  %v203_v33 = vrot.slane %v202_v31, 1 }
 0x1a3   : > { %v211_v34 = vmax.f32 %v209_v30, %v210_v32  ;;  %v204_v35 = vmin.f32 %v202_v31, %v203_v33 }
 0x1a5   : > { %269 = vpush %v204_v35  ;;  %v212_v36 = vrot.slane %v211_v34, 1 }
 0x1a7   : > { %v213_v37 = vmax.f32 %v211_v34, %v212_v36 }
 0x1a9   : > { %271 = vpush %v213_v37 }
 0x1d6   : > { %s270_s22 = spop %269 }
 0x1d7   : > { %v221_v40 = vstv %s270_s22 }
 0x1d8   : > { %v222_v41 = vsub.f32 %v193_v22, %v221_v40 }
 0x1da   : > { %s272_s23 = spop %271 }
 0x1db   : > { %s215_s24 = ssub.f32 %s272_s23, %s270_s22 }
 0x1dd   : > { %s216_s25 = sadd.f32 1e-06, %s215_s24 }
 0x1df   : > { %v217_v38 = vstv %s216_s25 }
 0x1e0   : > { %300 = vrcp.f32 %v217_v38 }
 0x1ea   : > { %v301_v39 = vpop.eup %300 }
 0x1eb   : > { %273 = vpush %v301_v39 }
 0x21c   : > { %s274_s26 = spop %273 }
 0x21d   : > { %v223_v42 = vstv %s274_s26 }
 0x21e   : > { %v224_v43 = vmul.f32 %v223_v42, %v222_v41 }
 0x220   : > { %v225_v44 = vmax.f32 %v224_v43, 0.5 }
 0x222   : > { %v226_v45 = vmin.f32 %v225_v44, 0.999999 }
 0x224   : > { %302 = vlog2.f32 %v226_v45  ;;  %v229_v46 = vsub.f32 1.0, %v226_v45 }
 0x226   : > { %304 = vlog2.f32 %v229_v46 }
 0x22e   : > { %v303_v47 = vpop.eup %302 }
 0x22f   : > { %v228_v49 = vmul.f32 0.6931472, %v303_v47 }
 0x230   : > { %v305_v48 = vpop.eup %304 }
 0x231   : > { %v231_v50 = vmul.f32 0.6931472, %v305_v48  ;;  %74 = sbr.rel (!%p72_p8) target bundleno = 61 (0x3d), region = 67 }
 0x233   : > { %v232_v52 = vsub.f32 %v228_v49, %v231_v50 }
 0x235   : > { %v234_v53 = vadd.f32 %v233_v51, %v232_v52 }
 0x237   : > { %235 = vst [vmem:[#allocation12] sm:$0xff] %v234_v53 }
 0x238   :  { %381 = shalt.err (!%p378_p13)
}
 0x239   :  { %s382_s7 = scalar_lea.hbm %s578_s6, 128 }
 0x23a   :  { %p383_p0 = scmp.ne.s32.totalorder %s578_s6, %s382_s7  ;;  %p386_p1 = scmp.lt.u32.totalorder %s382_s7, %s578_s6 }
 0x23c   :  { %p388_p2 = pnand %p386_p1, %p383_p0 }
 0x23e   :  { %391 = shalt.err (!%p388_p2)
}
 0x23f   :  { %245 = dma.vmem_to_hbm [thread:$0]  %s243_s27, 128, %s578_s6, [#allocation5]  }
 0x240   :  { %404 = dma.done.wait [#allocation5], 128  }
 0x241   :  { %405 = vsyncadd [#allocation5], 4294967168 }
 0x242   :  { %249 = vsyncpa [#allocation4], 1 }
 0x243   :  { %250 = vsyncpa [#allocation11], 1 }
 0x244   :  { %251 = vsyncpa [#allocation5], 1 }
 0x245   :  { %252 = vsyncpa [#allocation6], 1 }
 0x246   :  { %253 = vsyncpa [#allocation8], 1 }

</bundles_post_ra>
